<compile_context>
chip_gen: v6e
topology: v6e:2x2x1
jax: 0.10.0
libtpu: 0.0.40
codegen_flags: <defaults>
</compile_context>

<pallas_src>
import functools

import jax
import jax.numpy as jnp
from jax.experimental import pallas as pl
from jax.experimental.pallas import tpu as pltpu

LOG_STD_MAX = 2.0
LOG_STD_MIN = -5.0


def _round_up(n, m):
    return (n + m - 1) // m * m


def _actor_kernel(x_ref, w1_ref, b1_ref, w2_ref, b2_ref, wh_ref, bh_ref, out_ref,
                  *, act_dim):
    # x_ref  : (TB, D)     bf16  batch tile of observations
    # w1_ref : (D, H)      bf16  fc1 weight, pre-transposed to (in, out)
    # b1_ref : (1, H)      f32
    # w2_ref : (H, H)      bf16  fc2 weight, pre-transposed
    # b2_ref : (1, H)      f32
    # wh_ref : (H, OW)     bf16  [fc_mean | fc_logstd | 0-pad] fused head weight
    # bh_ref : (1, OW)     f32
    # out_ref: (TB, OW)    f32   [:, :A] = mean, [:, A:2A] = squashed log_std
    x = x_ref[...]

    # bf16 operands -> MXU native; f32 accumulation; f32 epilogue.
    h = jnp.dot(x, w1_ref[...], preferred_element_type=jnp.float32)
    h = jnp.maximum(h + b1_ref[...], 0.0)

    h = jnp.dot(h.astype(jnp.bfloat16), w2_ref[...],
                preferred_element_type=jnp.float32)
    h = jnp.maximum(h + b2_ref[...], 0.0)

    head = jnp.dot(h.astype(jnp.bfloat16), wh_ref[...],
                   preferred_element_type=jnp.float32) + bh_ref[...]

    # Columns [0, A) are the mean head; columns >= A (log_std + zero padding,
    # padding is sliced off in the wrapper) get the tanh + affine squash.
    col = jax.lax.broadcasted_iota(jnp.int32, head.shape, dimension=1)
    squashed = LOG_STD_MIN + 0.5 * (LOG_STD_MAX - LOG_STD_MIN) * (jnp.tanh(head) + 1.0)
    out_ref[...] = jnp.where(col >= act_dim, squashed, head).astype(out_ref.dtype)


@functools.partial(jax.jit, static_argnames=("tile_b",))
def actor_forward(x, params, tile_b=512):
    """x: (B, D) f32; params in torch (out, in) layout. Returns (mean, log_std)."""
    w1, b1, w2, b2, w_mean, b_mean, w_logstd, b_logstd = params
    B, D = x.shape
    H = w1.shape[0]
    A = w_mean.shape[0]
    out_w = max(128, _round_up(2 * A, 128))  # lane-dense output slab

    # Weight-only preprocessing, hoisted out of the kernel (no in-kernel
    # transposes; the two heads are fused into one matmul and zero-padded to
    # a full 128-lane output).
    w1_t = w1.T.astype(jnp.bfloat16)                                           # (D, H)
    w2_t = w2.T.astype(jnp.bfloat16)                                           # (H, H)
    wh = jnp.concatenate([w_mean.T, w_logstd.T], axis=1)                       # (H, 2A)
    wh = jnp.pad(wh, ((0, 0), (0, out_w - 2 * A))).astype(jnp.bfloat16)        # (H, OW)
    b1r = b1.reshape(1, H).astype(jnp.float32)
    b2r = b2.reshape(1, H).astype(jnp.float32)
    bh = jnp.concatenate([b_mean, b_logstd]).reshape(1, 2 * A)
    bh = jnp.pad(bh, ((0, 0), (0, out_w - 2 * A))).astype(jnp.float32)         # (1, OW)

    # Batch tiling: sublane dim of a block must be a multiple of 8; pad B up.
    tb = min(tile_b, _round_up(B, 8))
    b_pad = _round_up(B, tb)
    # v7x: keep >= 2 grid blocks on large batches so both TensorCores get work.
    if b_pad >= 2 * 256 and b_pad // tb < 2:
        tb = _round_up(b_pad // 2, 256)
        b_pad = _round_up(B, tb)
    if b_pad != B:
        x = jnp.pad(x, ((0, b_pad - B), (0, 0)))
    grid = (b_pad // tb,)

    kernel = functools.partial(_actor_kernel, act_dim=A)

    out = pl.pallas_call(
        kernel,
        out_shape=jax.ShapeDtypeStruct((b_pad, out_w), jnp.float32),
        grid_spec=pltpu.PrefetchScalarGridSpec(
            num_scalar_prefetch=0,
            grid=grid,
            in_specs=[
                pl.BlockSpec((tb, D), lambda i: (i, 0)),        # x: tiled over batch
                pl.BlockSpec((D, H), lambda i: (0, 0)),         # weights: VMEM-resident
                pl.BlockSpec((1, H), lambda i: (0, 0)),
                pl.BlockSpec((H, H), lambda i: (0, 0)),
                pl.BlockSpec((1, H), lambda i: (0, 0)),
                pl.BlockSpec((H, out_w), lambda i: (0, 0)),
                pl.BlockSpec((1, out_w), lambda i: (0, 0)),
            ],
            out_specs=pl.BlockSpec((tb, out_w), lambda i: (i, 0)),
        ),
        compiler_params=pltpu.CompilerParams(
            dimension_semantics=("parallel",),      # batch axis shards across TCs
            vmem_limit_bytes=32 * 1024 * 1024,      # headroom if tile_b is raised
        ),
    )(x.astype(jnp.bfloat16), w1_t, b1r, w2_t, b2r, wh, bh)

    mean = out[:B, :A]
    log_std = out[:B, A:2 * A]
    return mean, log_std


def _reference(x, params):
    w1, b1, w2, b2, w_mean, b_mean, w_logstd, b_logstd = params
    h = jnp.maximum(x @ w1.T + b1, 0.0)
    h = jnp.maximum(h @ w2.T + b2, 0.0)
    mean_ref = h @ w_mean.T + b_mean
    ls_ref = jnp.tanh(h @ w_logstd.T + b_logstd)
    ls_ref = LOG_STD_MIN + 0.5 * (LOG_STD_MAX - LOG_STD_MIN) * (ls_ref + 1.0)
    return mean_ref, ls_ref


if __name__ == "__main__":
    # Small shapes consistent with the module: batch=8, obs_dim=8,
    # hidden=256 (fixed by the module), act_dim=4.
    B, D, H, A = 8, 8, 256, 4

    key = jax.random.PRNGKey(0)
    ks = jax.random.split(key, 10)

    def _init(k, shape, scale):
        return jax.random.normal(k, shape, dtype=jnp.float32) * scale

    x = _init(ks[0], (B, D), 1.0)
    w1 = _init(ks[1], (H, D), 1.0 / float(D) ** 0.5)
    b1 = _init(ks[2], (H,), 0.1)
    w2 = _init(ks[3], (H, H), 1.0 / float(H) ** 0.5)
    b2 = _init(ks[4], (H,), 0.1)
    w_mean = _init(ks[5], (A, H), 1.0 / float(H) ** 0.5)
    b_mean = _init(ks[6], (A,), 0.1)
    w_logstd = _init(ks[7], (A, H), 1.0 / float(H) ** 0.5)
    b_logstd = _init(ks[8], (A,), 0.1)

    params = (w1, b1, w2, b2, w_mean, b_mean, w_logstd, b_logstd)

    # --- small-batch check (single block) ---
    mean, log_std = actor_forward(x, params)
    mean, log_std = jax.block_until_ready((mean, log_std))
    mean_ref, ls_ref = _reference(x, params)

    assert mean.shape == (B, A) and log_std.shape == (B, A)
    # bf16 matmul operands (f32 accumulation): loosened tolerance.
    assert jnp.allclose(mean, mean_ref, atol=5e-2, rtol=5e-2)
    assert jnp.allclose(log_std, ls_ref, atol=5e-2, rtol=5e-2)

    # --- larger batch: exercises batch padding and the multi-block parallel grid ---
    B2 = 600
    x2 = _init(ks[9], (B2, D), 1.0)
    mean2, log_std2 = actor_forward(x2, params)
    mean2, log_std2 = jax.block_until_ready((mean2, log_std2))
    mean2_ref, ls2_ref = _reference(x2, params)

    assert mean2.shape == (B2, A) and log_std2.shape == (B2, A)
    assert jnp.allclose(mean2, mean2_ref, atol=5e-2, rtol=5e-2)
    assert jnp.allclose(log_std2, ls2_ref, atol=5e-2, rtol=5e-2)

    # TODO(synk): Actor.get_action (Normal rsample + tanh-squash log-prob) is a
    # sampling path outside forward(); it is not implemented as a kernel here.

    print("KERNEL_OK")
</pallas_src>

<mosaic_0001>
module attributes {stable_mosaic.version = 11 : i64} {
  func.func @_actor_kernel(%arg0: i32, %arg1: memref<8x8xbf16, #tpu.memory_space<vmem>>, %arg2: memref<8x256xbf16, #tpu.memory_space<vmem>>, %arg3: memref<1x256xf32, #tpu.memory_space<vmem>>, %arg4: memref<256x256xbf16, #tpu.memory_space<vmem>>, %arg5: memref<1x256xf32, #tpu.memory_space<vmem>>, %arg6: memref<256x128xbf16, #tpu.memory_space<vmem>>, %arg7: memref<1x128xf32, #tpu.memory_space<vmem>>, %arg8: memref<8x128xf32, #tpu.memory_space<vmem>>) attributes {dimension_semantics = [#tpu.dimension_semantics<parallel>], iteration_bounds = array<i64: 1>, scalar_prefetch = 0 : i64, scratch_operands = 0 : i64, tpu.core_type = #tpu.core_type<tc>, window_params = [{transform_indices = @transform_0, window_bounds = array<i64: 8, 8>}, {pipeline_mode = #tpu.pipeline_mode<synchronous>, transform_indices = @transform_1, window_bounds = array<i64: 8, 256>}, {pipeline_mode = #tpu.pipeline_mode<synchronous>, transform_indices = @transform_2, window_bounds = array<i64: 1, 256>}, {pipeline_mode = #tpu.pipeline_mode<synchronous>, transform_indices = @transform_3, window_bounds = array<i64: 256, 256>}, {pipeline_mode = #tpu.pipeline_mode<synchronous>, transform_indices = @transform_4, window_bounds = array<i64: 1, 256>}, {pipeline_mode = #tpu.pipeline_mode<synchronous>, transform_indices = @transform_5, window_bounds = array<i64: 256, 128>}, {pipeline_mode = #tpu.pipeline_mode<synchronous>, transform_indices = @transform_6, window_bounds = array<i64: 1, 128>}, {transform_indices = @transform_7, window_bounds = array<i64: 8, 128>}]} {
    %c0 = arith.constant 0 : index
    %c0_0 = arith.constant 0 : index
    %0 = vector.load %arg1[%c0, %c0_0] : memref<8x8xbf16, #tpu.memory_space<vmem>>, vector<8x8xbf16>
    %c0_1 = arith.constant 0 : index
    %c0_2 = arith.constant 0 : index
    %1 = vector.load %arg2[%c0_1, %c0_2] : memref<8x256xbf16, #tpu.memory_space<vmem>>, vector<8x256xbf16>
    %cst = arith.constant dense<0.000000e+00> : vector<8x256xf32>
    %2 = tpu.matmul %0, %1, %cst {dimension_numbers = #tpu.dot_dimension_numbers<[1], [0], [0], [1], [0, 0, 1, 1], [], []>} : vector<8x8xbf16>, vector<8x256xbf16>, vector<8x256xf32> -> vector<8x256xf32>
    %c0_3 = arith.constant 0 : index
    %c0_4 = arith.constant 0 : index
    %3 = vector.load %arg3[%c0_3, %c0_4] : memref<1x256xf32, #tpu.memory_space<vmem>>, vector<1x256xf32>
    %4 = vector.broadcast %3 : vector<1x256xf32> to vector<8x256xf32>
    %5 = arith.addf %2, %4 : vector<8x256xf32>
    %cst_5 = arith.constant 0.000000e+00 : f32
    %6 = vector.broadcast %cst_5 : f32 to vector<8x256xf32>
    %7 = arith.maximumf %5, %6 : vector<8x256xf32>
    %8 = arith.truncf %7 : vector<8x256xf32> to vector<8x256xbf16>
    %c0_6 = arith.constant 0 : index
    %c0_7 = arith.constant 0 : index
    %9 = vector.load %arg4[%c0_6, %c0_7] : memref<256x256xbf16, #tpu.memory_space<vmem>>, vector<256x256xbf16>
    %cst_8 = arith.constant dense<0.000000e+00> : vector<8x256xf32>
    %10 = tpu.matmul %8, %9, %cst_8 {dimension_numbers = #tpu.dot_dimension_numbers<[1], [0], [0], [1], [0, 0, 1, 1], [], []>} : vector<8x256xbf16>, vector<256x256xbf16>, vector<8x256xf32> -> vector<8x256xf32>
    %c0_9 = arith.constant 0 : index
    %c0_10 = arith.constant 0 : index
    %11 = vector.load %arg5[%c0_9, %c0_10] : memref<1x256xf32, #tpu.memory_space<vmem>>, vector<1x256xf32>
    %12 = vector.broadcast %11 : vector<1x256xf32> to vector<8x256xf32>
    %13 = arith.addf %10, %12 : vector<8x256xf32>
    %cst_11 = arith.constant 0.000000e+00 : f32
    %14 = vector.broadcast %cst_11 : f32 to vector<8x256xf32>
    %15 = arith.maximumf %13, %14 : vector<8x256xf32>
    %16 = arith.truncf %15 : vector<8x256xf32> to vector<8x256xbf16>
    %c0_12 = arith.constant 0 : index
    %c0_13 = arith.constant 0 : index
    %17 = vector.load %arg6[%c0_12, %c0_13] : memref<256x128xbf16, #tpu.memory_space<vmem>>, vector<256x128xbf16>
    %cst_14 = arith.constant dense<0.000000e+00> : vector<8x128xf32>
    %18 = tpu.matmul %16, %17, %cst_14 {dimension_numbers = #tpu.dot_dimension_numbers<[1], [0], [0], [1], [0, 0, 1, 1], [], []>} : vector<8x256xbf16>, vector<256x128xbf16>, vector<8x128xf32> -> vector<8x128xf32>
    %c0_15 = arith.constant 0 : index
    %c0_16 = arith.constant 0 : index
    %19 = vector.load %arg7[%c0_15, %c0_16] : memref<1x128xf32, #tpu.memory_space<vmem>>, vector<1x128xf32>
    %20 = vector.broadcast %19 : vector<1x128xf32> to vector<8x128xf32>
    %21 = arith.addf %18, %20 : vector<8x128xf32>
    %22 = tpu.iota {dimensions = array<i32: 1>} : vector<8x128xi32>
    %23 = math.tanh %21 : vector<8x128xf32>
    %cst_17 = arith.constant 1.000000e+00 : f32
    %24 = vector.broadcast %cst_17 : f32 to vector<8x128xf32>
    %25 = arith.addf %23, %24 : vector<8x128xf32>
    %cst_18 = arith.constant 3.500000e+00 : f32
    %26 = vector.broadcast %cst_18 : f32 to vector<8x128xf32>
    %27 = arith.mulf %26, %25 : vector<8x128xf32>
    %cst_19 = arith.constant -5.000000e+00 : f32
    %28 = vector.broadcast %cst_19 : f32 to vector<8x128xf32>
    %29 = arith.addf %28, %27 : vector<8x128xf32>
    %c4_i32 = arith.constant 4 : i32
    %30 = vector.broadcast %c4_i32 : i32 to vector<8x128xi32>
    %31 = arith.cmpi sge, %22, %30 : vector<8x128xi32>
    %32 = arith.select %31, %29, %21 : vector<8x128xi1>, vector<8x128xf32>
    %c0_20 = arith.constant 0 : index
    %c0_21 = arith.constant 0 : index
    %33 = vector.load %arg8[%c0_20, %c0_21] : memref<8x128xf32, #tpu.memory_space<vmem>>, vector<8x128xf32>
    tpu.vector_store %arg8[%c0_20, %c0_21], %32 {strides = array<i32>} : memref<8x128xf32, #tpu.memory_space<vmem>>, vector<8x128xf32>,
    return
  }
  func.func @transform_0(%arg0: i32) -> (i32, i32) {
    %c0_i32 = arith.constant 0 : i32
    %c0_i32_0 = arith.constant 0 : i32
    return %arg0, %c0_i32 : i32, i32
  }
  func.func @transform_1(%arg0: i32) -> (i32, i32) {
    %c0_i32 = arith.constant 0 : i32
    %c0_i32_0 = arith.constant 0 : i32
    %c0_i32_1 = arith.constant 0 : i32
    return %c0_i32, %c0_i32_0 : i32, i32
  }
  func.func @transform_2(%arg0: i32) -> (i32, i32) {
    %c0_i32 = arith.constant 0 : i32
    %c0_i32_0 = arith.constant 0 : i32
    %c0_i32_1 = arith.constant 0 : i32
    return %c0_i32, %c0_i32_0 : i32, i32
  }
  func.func @transform_3(%arg0: i32) -> (i32, i32) {
    %c0_i32 = arith.constant 0 : i32
    %c0_i32_0 = arith.constant 0 : i32
    %c0_i32_1 = arith.constant 0 : i32
    return %c0_i32, %c0_i32_0 : i32, i32
  }
  func.func @transform_4(%arg0: i32) -> (i32, i32) {
    %c0_i32 = arith.constant 0 : i32
    %c0_i32_0 = arith.constant 0 : i32
    %c0_i32_1 = arith.constant 0 : i32
    return %c0_i32, %c0_i32_0 : i32, i32
  }
  func.func @transform_5(%arg0: i32) -> (i32, i32) {
    %c0_i32 = arith.constant 0 : i32
    %c0_i32_0 = arith.constant 0 : i32
    %c0_i32_1 = arith.constant 0 : i32
    return %c0_i32, %c0_i32_0 : i32, i32
  }
  func.func @transform_6(%arg0: i32) -> (i32, i32) {
    %c0_i32 = arith.constant 0 : i32
    %c0_i32_0 = arith.constant 0 : i32
    %c0_i32_1 = arith.constant 0 : i32
    return %c0_i32, %c0_i32_0 : i32, i32
  }
  func.func @transform_7(%arg0: i32) -> (i32, i32) {
    %c0_i32 = arith.constant 0 : i32
    %c0_i32_0 = arith.constant 0 : i32
    return %arg0, %c0_i32 : i32, i32
  }
}

</mosaic_0001>

<bundles_post_ra>
// kernel: actor_forward.1
= control target key start
LH: loop header
LB: loop body
LE: loop exit
PB: predicated region body
PF: predicated region fallthrough
CT: control target
= control target key end

     0   :  { %vm50_vm0 = vcmask 1043456   ;;  %v683_v1 = vmov 0   ;;  %vm46_vm1 = vcmask 64512   ;;  %v31_v50 = vlaneseq  ;;  %s886_s1 = inlined_call_operand.vmem [shape: bf16[8,256], index: 1, kind: input, shape index: {}]   ;;  %s887_s3 = inlined_call_operand.vmem [shape: bf16[256,256], index: 3, kind: input, shape index: {}]   ;;  %s888_s0 = inlined_call_operand.vmem [shape: bf16[8,8], index: 0, kind: input, shape index: {}]   ;;  %s889_s5 = inlined_call_operand.vmem [shape: bf16[256,128], index: 5, kind: input, shape index: {}]   ;;  %s890_s2 = inlined_call_operand.vmem [shape: f32[1,256], index: 2, kind: input, shape index: {}]   ;;  %s891_s4 = inlined_call_operand.vmem [shape: f32[1,256], index: 4, kind: input, shape index: {}]   ;;  %s892_s6 = inlined_call_operand.vmem [shape: f32[1,128], index: 6, kind: input, shape index: {}]   ;;  %s893_s7 = inlined_call_operand.vmem [shape: f32[8,128], index: 7, kind: output, shape index: {}]  }
   0x1   :  { %v28_v0 = vld [vmem:[%s886_s1] sm:$0xff]  ;;  %89 = vmatprep.mubr.bf16.mxu0 %v683_v1  ;;  %v617_v4 = vld [vmem:[%s887_s3 + $0x74] ss:$8 sps:$4 sm:$0xff]   ;;  %v619_v5 = vld [vmem:[%s887_s3 + $0x70] ss:$8 sps:$4 sm:$0xff]  }
   0x2   :  { %v540_v2 = vcombine.high %v28_v0, %v28_v0  ;;  %v539_v3 = vcombine.low %v28_v0, %v28_v0  ;;  %v620_v6 = vld [vmem:[%s887_s3 + $0x64] ss:$8 sps:$4 sm:$0xff]   ;;  %306 = vmatprep.subr.bf16.mxu1 %v617_v4  ;;  %v27_v8 = vld [vmem:[%s888_s0] sm:$0xf]  ;;  %v623_v10 = vld [vmem:[%s887_s3 + $0x54] ss:$8 sps:$4 sm:$0xff]  }
   0x3   :  { %307 = vmatpush1.bf16.msra.mxu1 %v619_v5  ;;  %v622_v9 = vld [vmem:[%s887_s3 + $0x60] ss:$8 sps:$4 sm:$0xff]   ;;  %v625_v11 = vld [vmem:[%s887_s3 + $0x50] ss:$8 sps:$4 sm:$0xff]   ;;  %v626_v12 = vld [vmem:[%s887_s3 + $0x44] ss:$8 sps:$4 sm:$0xff]  }
   0x4   :  { %541 = vmatprep.subr.msk.bf16.mxu0 %vm50_vm0, %v540_v2  ;;  %v52_v7 = vsel %vm50_vm0, %v539_v3, 0  ;;  %308 = vmatprep.subr.bf16.mxu1 %v620_v6  ;;  %v628_v13 = vld [vmem:[%s887_s3 + $0x40] ss:$8 sps:$4 sm:$0xff]   ;;  %v629_v14 = vld [vmem:[%s887_s3 + $0x34] ss:$8 sps:$4 sm:$0xff]   ;;  %v32_v51 = vshrl.u32 %v31_v50, 7 }
   0x5   :  { %72 = vmatpush1.bf16.msra.mxu0 %v52_v7  ;;  %v631_v15 = vld [vmem:[%s887_s3 + $0x30] ss:$8 sps:$4 sm:$0xff]   ;;  %v632_v16 = vld [vmem:[%s887_s3 + $0x24] ss:$8 sps:$4 sm:$0xff]   ;;  %v634_v17 = vld [vmem:[%s887_s3 + $0x20] ss:$8 sps:$4 sm:$0xff]  }
   0x6   :  { %v635_v18 = vld [vmem:[%s887_s3 + $0x14] ss:$8 sps:$4 sm:$0xff]   ;;  %v637_v19 = vld [vmem:[%s887_s3 + $0x10] ss:$8 sps:$4 sm:$0xff]   ;;  %v638_v20 = vld [vmem:[%s887_s3 + $0x4] ss:$8 sps:$4 sm:$0xff]  }
   0x7   :  { %309 = vmatpush1.bf16.msra.mxu1 %v622_v9  ;;  %v640_v21 = vld [vmem:[%s887_s3] ss:$8 sps:$4 sm:$0xff]   ;;  %v641_v22 = vld [vmem:[%s887_s3 + $0xf4] ss:$8 sps:$4 sm:$0xff]   ;;  %v643_v23 = vld [vmem:[%s887_s3 + $0xf0] ss:$8 sps:$4 sm:$0xff]  }
   0x8   :  { %542 = vmatmul.mubr.msk.bf16.vlgmr.msra.gmra.mxu0 %vm46_vm1, %v27_v8  ;;  %310 = vmatprep.subr.bf16.mxu1 %v623_v10  ;;  %v644_v24 = vld [vmem:[%s887_s3 + $0xe4] ss:$8 sps:$4 sm:$0xff]   ;;  %v646_v25 = vld [vmem:[%s887_s3 + $0xe0] ss:$8 sps:$4 sm:$0xff]   ;;  %v647_v26 = vld [vmem:[%s887_s3 + $0xd4] ss:$8 sps:$4 sm:$0xff]  }
   0x9   :  { %v649_v27 = vld [vmem:[%s887_s3 + $0xd0] ss:$8 sps:$4 sm:$0xff]   ;;  %v650_v28 = vld [vmem:[%s887_s3 + $0xc4] ss:$8 sps:$4 sm:$0xff]   ;;  %v652_v29 = vld [vmem:[%s887_s3 + $0xc0] ss:$8 sps:$4 sm:$0xff]  }
   0xa   :  { %v653_v30 = vld [vmem:[%s887_s3 + $0xb4] ss:$8 sps:$4 sm:$0xff]   ;;  %v655_v31 = vld [vmem:[%s887_s3 + $0xb0] ss:$8 sps:$4 sm:$0xff]   ;;  %v656_v32 = vld [vmem:[%s887_s3 + $0xa4] ss:$8 sps:$4 sm:$0xff]  }
   0xb   :  { %311 = vmatpush1.bf16.msra.mxu1 %v625_v11  ;;  %v658_v33 = vld [vmem:[%s887_s3 + $0xa0] ss:$8 sps:$4 sm:$0xff]   ;;  %v659_v34 = vld [vmem:[%s887_s3 + $0x94] ss:$8 sps:$4 sm:$0xff]   ;;  %v661_v35 = vld [vmem:[%s887_s3 + $0x90] ss:$8 sps:$4 sm:$0xff]  }
   0xc   :  { %312 = vmatprep.subr.bf16.mxu1 %v626_v12  ;;  %v662_v36 = vld [vmem:[%s887_s3 + $0x84] ss:$8 sps:$4 sm:$0xff]   ;;  %v664_v37 = vld [vmem:[%s887_s3 + $0x80] ss:$8 sps:$4 sm:$0xff]   ;;  %v665_v38 = vld [vmem:[%s889_s5 + $0x78] sm:$0xff]   ;;  %v33_v52 = vsub.s32 0, %v32_v51 }
   0xd   :  { %v666_v39 = vld [vmem:[%s889_s5 + $0x38] sm:$0xff]   ;;  %592 = vmatprep.subr.bf16.mxu0 %v665_v38  ;;  %v667_v40 = vld [vmem:[%s889_s5 + $0x70] sm:$0xff]   ;;  %v669_v42 = vld [vmem:[%s889_s5 + $0x68] sm:$0xff]   ;;  %v37_v54 = vsub.s32 1, %v32_v51 }
   0xe   :  { %593 = vmatpush3.bf16.msra.mxu0 %v666_v39  ;;  %v668_v41 = vld [vmem:[%s889_s5 + $0x30] sm:$0xff]   ;;  %v670_v43 = vld [vmem:[%s889_s5 + $0x28] sm:$0xff]   ;;  %v671_v44 = vld [vmem:[%s889_s5 + $0x60] sm:$0xff]  }
   0xf   :  { %313 = vmatpush1.bf16.msra.mxu1 %v628_v13  ;;  %594 = vmatprep.subr.bf16.mxu0 %v667_v40  ;;  %v672_v45 = vld [vmem:[%s889_s5 + $0x20] sm:$0xff]   ;;  %v673_v46 = vld [vmem:[%s889_s5 + $0x58] sm:$0xff]   ;;  %v675_v48 = vld [vmem:[%s889_s5 + $0x50] sm:$0xff]  }
  0x10   :  { %314 = vmatprep.subr.bf16.mxu1 %v629_v14  ;;  %v674_v47 = vld [vmem:[%s889_s5 + $0x18] sm:$0xff]   ;;  %v676_v49 = vld [vmem:[%s889_s5 + $0x10] sm:$0xff]   ;;  %v29_v53 = vld [vmem:[%s890_s2] sm:$0x3] }
  0x11   :  { %v34_v55 = vrot.slane %v29_v53, %v33_v52  ;;  %v38_v56 = vrot.slane %v29_v53, %v37_v54  ;;  %v677_v3 = vld [vmem:[%s889_s5 + $0x48] sm:$0xff]   ;;  %v679_v5 = vld [vmem:[%s889_s5 + $0x40] sm:$0xff]  }
  0x12   :  { %595 = vmatpush3.bf16.msra.mxu0 %v668_v41  ;;  %v678_v4 = vld [vmem:[%s889_s5 + $0x8] sm:$0xff]   ;;  %v680_v6 = vld [vmem:[%s889_s5] sm:$0xff]  }
  0x13   :  { %315 = vmatpush1.bf16.msra.mxu1 %v631_v15  ;;  %596 = vmatprep.subr.bf16.mxu0 %v669_v42  ;;  %v134_v7 = vld [vmem:[%s891_s4] sm:$0x3] }
  0x14   :  { %316 = vmatprep.subr.bf16.mxu1 %v632_v16  ;;  %v139_v8 = vrot.slane %v134_v7, %v33_v52  ;;  %v143_v9 = vrot.slane %v134_v7, %v37_v54 }
  0x16   :  { %597 = vmatpush3.bf16.msra.mxu0 %v670_v43 }
  0x17   :  { %317 = vmatpush1.bf16.msra.mxu1 %v634_v17  ;;  %598 = vmatprep.subr.bf16.mxu0 %v671_v44 }
  0x18   :  { %318 = vmatprep.subr.bf16.mxu1 %v635_v18 }
  0x1a   :  { %599 = vmatpush3.bf16.msra.mxu0 %v672_v45 }
  0x1b   :  { %319 = vmatpush1.bf16.msra.mxu1 %v637_v19  ;;  %600 = vmatprep.subr.bf16.mxu0 %v673_v46 }
  0x1c   :  { %320 = vmatprep.subr.bf16.mxu1 %v638_v20 }
  0x1e   :  { %601 = vmatpush3.bf16.msra.mxu0 %v674_v47 }
  0x1f   :  { %321 = vmatpush1.bf16.msra.mxu1 %v640_v21  ;;  %602 = vmatprep.subr.bf16.mxu0 %v675_v48  ;;  %v575_v21 = vld [vmem:[%s892_s6] ss:$0 sm:$0xff] }
  0x20   :  { %322 = vmatprep.subr.bf16.mxu1 %v641_v22 }
  0x22   :  { %603 = vmatpush3.bf16.msra.mxu0 %v676_v49 }
  0x23   :  { %323 = vmatpush2.bf16.msra.mxu1 %v643_v23  ;;  %604 = vmatprep.subr.bf16.mxu0 %v677_v3 }
  0x24   :  { %324 = vmatprep.subr.bf16.mxu1 %v644_v24 }
  0x26   :  { %605 = vmatpush3.bf16.msra.mxu0 %v678_v4 }
  0x27   :  { %325 = vmatpush2.bf16.msra.mxu1 %v646_v25  ;;  %606 = vmatprep.subr.bf16.mxu0 %v679_v5 }
  0x28   :  { %326 = vmatprep.subr.bf16.mxu1 %v647_v26 }
  0x2a   :  { %607 = vmatpush3.bf16.msra.mxu0 %v680_v6 }
  0x2b   :  { %327 = vmatpush2.bf16.msra.mxu1 %v649_v27 }
  0x2c   :  { %328 = vmatprep.subr.bf16.mxu1 %v650_v28  ;;  %v527_v28 = vand.u32 127, %v31_v50 }
  0x2e   :  { %vm532_vm2 = vcmp.ge.s32.totalorder %v527_v28, 4 }
  0x2f   :  { %329 = vmatpush2.bf16.msra.mxu1 %v652_v29 }
  0x30   :  { %330 = vmatprep.subr.bf16.mxu1 %v653_v30 }
  0x33   :  { %331 = vmatpush2.bf16.msra.mxu1 %v655_v31 }
  0x34   :  { %332 = vmatprep.subr.bf16.mxu1 %v656_v32 }
  0x37   :  { %333 = vmatpush2.bf16.msra.mxu1 %v658_v33 }
  0x38   :  { %334 = vmatprep.subr.bf16.mxu1 %v659_v34 }
  0x3b   :  { %335 = vmatpush2.bf16.msra.mxu1 %v661_v35 }
  0x3c   :  { %336 = vmatprep.subr.bf16.mxu1 %v662_v36 }
  0x3f   :  { %337 = vmatpush2.bf16.msra.mxu1 %v664_v37 }
  0xc8   :  { %v91_v57 = vpop.f32.mrf.mxu0 }
  0xc9   :  { %v92_v58 = vadd.f32 %v91_v57, %v34_v55 }
  0xca   :  { %v93_v59 = vpop.f32.mrf.mxu0 }
  0xcb   :  { %v94_v60 = vadd.f32 %v93_v59, %v38_v56  ;;  %v98_v61 = vmax.f32 %v92_v58, 0.0 }
  0xcc   :  { %v95_v62 = vpop.f32.mrf.mxu0 }
  0xcd   :  { %v99_v63 = vmax.f32 %v94_v60, 0.0  ;;  %v100_v2 = vpack.c.bf16 %v98_v61, %v98_v61 }
  0xce   :  { %v96_v0 = vpop.f32.mrf.mxu0 }
  0xcf   :  { %v101_v1 = vpack.c.bf16 %v99_v63, %v99_v63 }
  0xd1   :  { %338 = vmatprep.mubr.bf16.mxu1 %v101_v1 }
  0xd2   :  { %339 = vmatmul.mubr.bf16.vlgmr.msra.gmra.mxu1 %v100_v2 }
 0x192   :  { %v340_v10 = vpop.f32.mrf.mxu1 }
 0x193   :  { %v341_v11 = vadd.f32 %v340_v10, %v139_v8 }
 0x194   :  { %v342_v12 = vpop.f32.mrf.mxu1 }
 0x195   :  { %v343_v13 = vadd.f32 %v342_v12, %v143_v9  ;;  %v347_v14 = vmax.f32 %v341_v11, 0.0 }
 0x196   :  { %v344_v15 = vpop.f32.mrf.mxu1 }
 0x197   :  { %v348_v16 = vmax.f32 %v343_v13, 0.0  ;;  %v349_v19 = vpack.c.bf16 %v347_v14, %v347_v14 }
 0x198   :  { %v345_v17 = vpop.f32.mrf.mxu1 }
 0x199   :  { %v350_v18 = vpack.c.bf16 %v348_v16, %v348_v16 }
 0x19b   :  { %518 = vmatprep.mubr.bf16.mxu0 %v350_v18 }
 0x19c   :  { %519 = vmatmul.mubr.bf16.vlgmr.msra.gmra.mxu0 %v349_v19 }
 0x25c   :  { %v608_v20 = vpop.f32.mrf.mxu0 }
 0x25e   :  { %v609_v22 = vpop.f32.mrf.mxu0 }
 0x25f   :  { %v610_v23 = vadd.f32 %v609_v22, %v608_v20 }
 0x260   :  { %v611_v24 = vpop.f32.mrf.mxu0 }
 0x261   :  { %v521_v25 = vadd.f32 %v610_v23, %v575_v21 }
 0x262   :  { %v612_v26 = vpop.f32.mrf.mxu0 }
 0x263   :  { %681 = vtanh.f32 %v521_v25 }
 0x270   :  { %v682_v27 = vpop.eup %681 }
 0x271   :  { %v529_v29 = vadd.f32 1.0, %v682_v27 }
 0x273   :  { %v530_v30 = vmul.f32 3.5, %v529_v29 }
 0x275   :  { %v531_v31 = vadd.f32 -5.0, %v530_v30 }
 0x277   :  { %v533_v32 = vsel %vm532_vm2, %v531_v31, %v521_v25 }
 0x278   :  { %534 = vst [vmem:[%s893_s7] sm:$0xff] %v533_v32 }

</bundles_post_ra>
